<compile_context>
chip_gen: v6e
topology: v6e:2x2x1
jax: 0.10.0
libtpu: 0.0.40
codegen_flags: <defaults>
</compile_context>

<pallas_src>
import jax
import jax.numpy as jnp
from jax.experimental import pallas as pl
from jax.experimental.pallas import tpu as pltpu


def _round_up(x, m):
    return ((x + m - 1) // m) * m


def deepset_kernel(x_ref, w1_ref, b1_ref, w2_ref, b2_ref, o_ref, acc_ref):
    # x_ref  : (TS, F, TB) bf16 -- TS set elements, batch on the lane axis
    # w1_ref : (H, F)      bf16 -- linear1 weight (transposed), resident
    # b1_ref : (H, 1)      f32  -- linear1 bias, resident
    # w2_ref : (H, 1)      f32  -- linear2 weight with the 1/S mean folded in
    # b2_ref : (1,)        f32  -- linear2 bias, scalar in SMEM
    # o_ref  : (1, TB)     f32  -- lane-dense output block
    # acc_ref: (1, TB)     f32  -- per-batch pooling accumulator (VMEM scratch)
    j = pl.program_id(1)

    @pl.when(j == 0)
    def _init():
        acc_ref[...] = jnp.zeros_like(acc_ref)

    # Partial pool over this step's TS set elements.  Static Python loop:
    # x_ref[t] is a zero-cost static slice; each matmul is (H,F)@(F,TB) on
    # the MXU with f32 accumulation (K=4 -> the MXU is never the bottleneck).
    z = jnp.zeros((1, x_ref.shape[2]), jnp.float32)
    for t in range(x_ref.shape[0]):
        h = jnp.dot(w1_ref[...], x_ref[t],
                    preferred_element_type=jnp.float32)            # (H, TB)
        h = jnp.maximum(h + b1_ref[...], 0.0)                      # f32 epilogue
        # linear2 (H -> 1) applied before pooling: VPU mul + sublane reduce.
        z = z + jnp.sum(h * w2_ref[...], axis=0, keepdims=True)    # (1, TB)
    acc_ref[...] += z

    @pl.when(j == pl.num_programs(1) - 1)
    def _finalize():
        o_ref[...] = jax.nn.sigmoid(
            acc_ref[...] + b2_ref[0]).astype(o_ref.dtype)


def deepset_forward(x, w1, b1, w2, b2, *, set_tile=None, batch_tile=None):
    """x: (B, S, F); w1: (F, H); b1: (H,); w2: (H, 1); b2: (1,). Returns (B, 1)."""
    B, S, F = x.shape
    H = w1.shape[1]

    # Lane-dense batch tiling (multiple of 128; aim for >=1024 lanes at scale).
    if batch_tile is None:
        batch_tile = min(1024, _round_up(B, 128))
    B_pad = _round_up(B, batch_tile)

    # Set-dimension tiling: TS set elements per reduction step (amortizes the
    # ~0.35us per-grid-step overhead at scale; must divide S).
    if set_tile is None:
        set_tile = S
    assert S % set_tile == 0, (S, set_tile)

    # --- wrapper-side layout plumbing (at scale produce (S, F, B) upstream).
    x_sfb = jnp.transpose(x, (1, 2, 0))                          # (S, F, B)
    x_sfb = jnp.pad(x_sfb, ((0, 0), (0, 0), (0, B_pad - B)))     # pad batch
    x_sfb = x_sfb.astype(jnp.bfloat16)                           # bf16 stream
    w1_t = w1.T.astype(jnp.bfloat16)                             # (H, F) bf16
    b1_c = b1.reshape(H, 1).astype(jnp.float32)                  # (H, 1) f32
    w2_c = (w2.reshape(H, 1) / S).astype(jnp.float32)            # mean folded
    b2_s = jnp.asarray(b2, jnp.float32).reshape(1)               # SMEM scalar

    grid = (B_pad // batch_tile, S // set_tile)

    grid_spec = pltpu.PrefetchScalarGridSpec(
        num_scalar_prefetch=0,
        grid=grid,
        in_specs=[
            pl.BlockSpec((set_tile, F, batch_tile), lambda i, j: (j, 0, i)),
            pl.BlockSpec((H, F), lambda i, j: (0, 0)),   # resident weights
            pl.BlockSpec((H, 1), lambda i, j: (0, 0)),
            pl.BlockSpec((H, 1), lambda i, j: (0, 0)),
            pl.BlockSpec(memory_space=pltpu.MemorySpace.SMEM),
        ],
        out_specs=pl.BlockSpec((1, batch_tile), lambda i, j: (0, i)),
        scratch_shapes=[pltpu.VMEM((1, batch_tile), jnp.float32)],
    )

    out = pl.pallas_call(
        deepset_kernel,
        out_shape=jax.ShapeDtypeStruct((1, B_pad), jnp.float32),
        grid_spec=grid_spec,
        compiler_params=pltpu.CompilerParams(
            dimension_semantics=("parallel", "arbitrary")),
    )(x_sfb, w1_t, b1_c, w2_c, b2_s)

    # Slice the padded lanes off and return the PyTorch layout (B, 1).
    return out[0, :B].reshape(B, 1)


def deepset_reference(x, w1, b1, w2, b2):
    # Matches the kernel's numerics: bf16 inputs to linear1, f32 elsewhere.
    xb = x.astype(jnp.bfloat16).astype(jnp.float32)
    w1b = w1.astype(jnp.bfloat16).astype(jnp.float32)
    h = (xb[:, :, :, None] * w1b[None, None, :, :]).sum(axis=2) + b1
    h = jnp.maximum(h, 0.0)                                  # (B, S, H)
    p = h.mean(axis=1)                                       # (B, H)
    y = (p * w2[:, 0][None, :]).sum(axis=1, keepdims=True) + b2
    return jax.nn.sigmoid(y)


if __name__ == "__main__":
    # Small shapes consistent with the module: batch=2, set size=8,
    # in_features=4, hidden_size=32.
    B, S, F, H = 2, 8, 4, 32

    key = jax.random.PRNGKey(0)
    kx, kw1, kb1, kw2, kb2 = jax.random.split(key, 5)

    x = jax.random.normal(kx, (B, S, F), dtype=jnp.float32)

    # Deterministic parameter init (uniform, PyTorch-Linear-style bounds).
    bound1 = 1.0 / (F ** 0.5)
    w1 = jax.random.uniform(kw1, (F, H), jnp.float32, -bound1, bound1)
    b1 = jax.random.uniform(kb1, (H,), jnp.float32, -bound1, bound1)
    bound2 = 1.0 / (H ** 0.5)
    w2 = jax.random.uniform(kw2, (H, 1), jnp.float32, -bound2, bound2)
    b2 = jax.random.uniform(kb2, (1,), jnp.float32, -bound2, bound2)

    # set_tile=4 -> two reduction steps over S, exercising the cross-step
    # VMEM pooling accumulator (init at j==0, finalize at the last step).
    out = jax.block_until_ready(deepset_forward(x, w1, b1, w2, b2, set_tile=4))
    ref = deepset_reference(x, w1, b1, w2, b2)

    assert out.shape == (B, 1), out.shape
    assert jnp.allclose(out, ref, atol=1e-4, rtol=1e-4), (out, ref)

    print("KERNEL_OK")
</pallas_src>

<mosaic_0001>
module attributes {stable_mosaic.version = 11 : i64} {
  func.func @deepset_kernel(%arg0: i32, %arg1: i32, %arg2: memref<4x4x128xbf16, #tpu.memory_space<vmem>>, %arg3: memref<32x4xbf16, #tpu.memory_space<vmem>>, %arg4: memref<32x1xf32, #tpu.memory_space<vmem>>, %arg5: memref<32x1xf32, #tpu.memory_space<vmem>>, %arg6: memref<1xf32, #tpu.memory_space<smem>>, %arg7: memref<1x128xf32, #tpu.memory_space<vmem>>, %arg8: memref<1x128xf32, #tpu.memory_space<vmem>>) attributes {dimension_semantics = [#tpu.dimension_semantics<parallel>, #tpu.dimension_semantics<arbitrary>], iteration_bounds = array<i64: 1, 2>, scalar_prefetch = 0 : i64, scratch_operands = 1 : i64, tpu.core_type = #tpu.core_type<tc>, window_params = [{transform_indices = @transform_0, window_bounds = array<i64: 4, 4, 128>}, {pipeline_mode = #tpu.pipeline_mode<synchronous>, transform_indices = @transform_1, window_bounds = array<i64: 32, 4>}, {pipeline_mode = #tpu.pipeline_mode<synchronous>, transform_indices = @transform_2, window_bounds = array<i64: 32, 1>}, {pipeline_mode = #tpu.pipeline_mode<synchronous>, transform_indices = @transform_3, window_bounds = array<i64: 32, 1>}, {transform_indices = @transform_4, window_bounds = array<i64: 1>}, {transform_indices = @transform_5, window_bounds = array<i64: 1, 128>}]} {
    %c0_i32 = arith.constant 0 : i32
    %0 = arith.cmpi eq, %arg1, %c0_i32 : i32
    %1 = arith.extui %0 : i1 to i32
    %c0_i32_0 = arith.constant 0 : i32
    %2 = arith.cmpi ne, %1, %c0_i32_0 : i32
    scf.if %2 {
      %cst_50 = arith.constant 0.000000e+00 : f32
      %70 = vector.broadcast %cst_50 : f32 to vector<1x128xf32>
      %c0_51 = arith.constant 0 : index
      %c0_52 = arith.constant 0 : index
      %71 = vector.load %arg8[%c0_51, %c0_52] : memref<1x128xf32, #tpu.memory_space<vmem>>, vector<1x128xf32>
      tpu.vector_store %arg8[%c0_51, %c0_52], %70 {strides = array<i32>} : memref<1x128xf32, #tpu.memory_space<vmem>>, vector<1x128xf32>,
    } else {
    }
    %cst = arith.constant 0.000000e+00 : f32
    %3 = vector.broadcast %cst : f32 to vector<1x128xf32>
    %c0 = arith.constant 0 : index
    %c0_1 = arith.constant 0 : index
    %4 = vector.load %arg3[%c0, %c0_1] : memref<32x4xbf16, #tpu.memory_space<vmem>>, vector<32x4xbf16>
    %c0_2 = arith.constant 0 : index
    %c0_3 = arith.constant 0 : index
    %c0_4 = arith.constant 0 : index
    %5 = vector.load %arg2[%c0_2, %c0_3, %c0_4] : memref<4x4x128xbf16, #tpu.memory_space<vmem>>, vector<1x4x128xbf16>
    %6 = vector.shape_cast %5 : vector<1x4x128xbf16> to vector<4x128xbf16>
    %cst_5 = arith.constant dense<0.000000e+00> : vector<32x128xf32>
    %7 = tpu.matmul %4, %6, %cst_5 {dimension_numbers = #tpu.dot_dimension_numbers<[1], [0], [0], [1], [0, 0, 1, 1], [], []>} : vector<32x4xbf16>, vector<4x128xbf16>, vector<32x128xf32> -> vector<32x128xf32>
    %c0_6 = arith.constant 0 : index
    %c0_7 = arith.constant 0 : index
    %8 = vector.load %arg4[%c0_6, %c0_7] : memref<32x1xf32, #tpu.memory_space<vmem>>, vector<32x1xf32>
    %9 = vector.broadcast %8 : vector<32x1xf32> to vector<32x128xf32>
    %10 = arith.addf %7, %9 : vector<32x128xf32>
    %cst_8 = arith.constant 0.000000e+00 : f32
    %11 = vector.broadcast %cst_8 : f32 to vector<32x128xf32>
    %12 = arith.maximumf %10, %11 : vector<32x128xf32>
    %c0_9 = arith.constant 0 : index
    %c0_10 = arith.constant 0 : index
    %13 = vector.load %arg5[%c0_9, %c0_10] : memref<32x1xf32, #tpu.memory_space<vmem>>, vector<32x1xf32>
    %14 = vector.broadcast %13 : vector<32x1xf32> to vector<32x128xf32>
    %15 = arith.mulf %12, %14 : vector<32x128xf32>
    %cst_11 = arith.constant dense<0.000000e+00> : vector<128xf32>
    %16 = vector.multi_reduction <add>, %15, %cst_11 [0] : vector<32x128xf32> to vector<128xf32>
    %17 = vector.shape_cast %16 : vector<128xf32> to vector<1x128xf32>
    %18 = arith.addf %3, %17 : vector<1x128xf32>
    %c0_12 = arith.constant 0 : index
    %c0_13 = arith.constant 0 : index
    %19 = vector.load %arg3[%c0_12, %c0_13] : memref<32x4xbf16, #tpu.memory_space<vmem>>, vector<32x4xbf16>
    %c1 = arith.constant 1 : index
    %c0_14 = arith.constant 0 : index
    %c0_15 = arith.constant 0 : index
    %20 = vector.load %arg2[%c1, %c0_14, %c0_15] : memref<4x4x128xbf16, #tpu.memory_space<vmem>>, vector<1x4x128xbf16>
    %21 = vector.shape_cast %20 : vector<1x4x128xbf16> to vector<4x128xbf16>
    %cst_16 = arith.constant dense<0.000000e+00> : vector<32x128xf32>
    %22 = tpu.matmul %19, %21, %cst_16 {dimension_numbers = #tpu.dot_dimension_numbers<[1], [0], [0], [1], [0, 0, 1, 1], [], []>} : vector<32x4xbf16>, vector<4x128xbf16>, vector<32x128xf32> -> vector<32x128xf32>
    %c0_17 = arith.constant 0 : index
    %c0_18 = arith.constant 0 : index
    %23 = vector.load %arg4[%c0_17, %c0_18] : memref<32x1xf32, #tpu.memory_space<vmem>>, vector<32x1xf32>
    %24 = vector.broadcast %23 : vector<32x1xf32> to vector<32x128xf32>
    %25 = arith.addf %22, %24 : vector<32x128xf32>
    %cst_19 = arith.constant 0.000000e+00 : f32
    %26 = vector.broadcast %cst_19 : f32 to vector<32x128xf32>
    %27 = arith.maximumf %25, %26 : vector<32x128xf32>
    %c0_20 = arith.constant 0 : index
    %c0_21 = arith.constant 0 : index
    %28 = vector.load %arg5[%c0_20, %c0_21] : memref<32x1xf32, #tpu.memory_space<vmem>>, vector<32x1xf32>
    %29 = vector.broadcast %28 : vector<32x1xf32> to vector<32x128xf32>
    %30 = arith.mulf %27, %29 : vector<32x128xf32>
    %cst_22 = arith.constant dense<0.000000e+00> : vector<128xf32>
    %31 = vector.multi_reduction <add>, %30, %cst_22 [0] : vector<32x128xf32> to vector<128xf32>
    %32 = vector.shape_cast %31 : vector<128xf32> to vector<1x128xf32>
    %33 = arith.addf %18, %32 : vector<1x128xf32>
    %c0_23 = arith.constant 0 : index
    %c0_24 = arith.constant 0 : index
    %34 = vector.load %arg3[%c0_23, %c0_24] : memref<32x4xbf16, #tpu.memory_space<vmem>>, vector<32x4xbf16>
    %c2 = arith.constant 2 : index
    %c0_25 = arith.constant 0 : index
    %c0_26 = arith.constant 0 : index
    %35 = vector.load %arg2[%c2, %c0_25, %c0_26] : memref<4x4x128xbf16, #tpu.memory_space<vmem>>, vector<1x4x128xbf16>
    %36 = vector.shape_cast %35 : vector<1x4x128xbf16> to vector<4x128xbf16>
    %cst_27 = arith.constant dense<0.000000e+00> : vector<32x128xf32>
    %37 = tpu.matmul %34, %36, %cst_27 {dimension_numbers = #tpu.dot_dimension_numbers<[1], [0], [0], [1], [0, 0, 1, 1], [], []>} : vector<32x4xbf16>, vector<4x128xbf16>, vector<32x128xf32> -> vector<32x128xf32>
    %c0_28 = arith.constant 0 : index
    %c0_29 = arith.constant 0 : index
    %38 = vector.load %arg4[%c0_28, %c0_29] : memref<32x1xf32, #tpu.memory_space<vmem>>, vector<32x1xf32>
    %39 = vector.broadcast %38 : vector<32x1xf32> to vector<32x128xf32>
    %40 = arith.addf %37, %39 : vector<32x128xf32>
    %cst_30 = arith.constant 0.000000e+00 : f32
    %41 = vector.broadcast %cst_30 : f32 to vector<32x128xf32>
    %42 = arith.maximumf %40, %41 : vector<32x128xf32>
    %c0_31 = arith.constant 0 : index
    %c0_32 = arith.constant 0 : index
    %43 = vector.load %arg5[%c0_31, %c0_32] : memref<32x1xf32, #tpu.memory_space<vmem>>, vector<32x1xf32>
    %44 = vector.broadcast %43 : vector<32x1xf32> to vector<32x128xf32>
    %45 = arith.mulf %42, %44 : vector<32x128xf32>
    %cst_33 = arith.constant dense<0.000000e+00> : vector<128xf32>
    %46 = vector.multi_reduction <add>, %45, %cst_33 [0] : vector<32x128xf32> to vector<128xf32>
    %47 = vector.shape_cast %46 : vector<128xf32> to vector<1x128xf32>
    %48 = arith.addf %33, %47 : vector<1x128xf32>
    %c0_34 = arith.constant 0 : index
    %c0_35 = arith.constant 0 : index
    %49 = vector.load %arg3[%c0_34, %c0_35] : memref<32x4xbf16, #tpu.memory_space<vmem>>, vector<32x4xbf16>
    %c3 = arith.constant 3 : index
    %c0_36 = arith.constant 0 : index
    %c0_37 = arith.constant 0 : index
    %50 = vector.load %arg2[%c3, %c0_36, %c0_37] : memref<4x4x128xbf16, #tpu.memory_space<vmem>>, vector<1x4x128xbf16>
    %51 = vector.shape_cast %50 : vector<1x4x128xbf16> to vector<4x128xbf16>
    %cst_38 = arith.constant dense<0.000000e+00> : vector<32x128xf32>
    %52 = tpu.matmul %49, %51, %cst_38 {dimension_numbers = #tpu.dot_dimension_numbers<[1], [0], [0], [1], [0, 0, 1, 1], [], []>} : vector<32x4xbf16>, vector<4x128xbf16>, vector<32x128xf32> -> vector<32x128xf32>
    %c0_39 = arith.constant 0 : index
    %c0_40 = arith.constant 0 : index
    %53 = vector.load %arg4[%c0_39, %c0_40] : memref<32x1xf32, #tpu.memory_space<vmem>>, vector<32x1xf32>
    %54 = vector.broadcast %53 : vector<32x1xf32> to vector<32x128xf32>
    %55 = arith.addf %52, %54 : vector<32x128xf32>
    %cst_41 = arith.constant 0.000000e+00 : f32
    %56 = vector.broadcast %cst_41 : f32 to vector<32x128xf32>
    %57 = arith.maximumf %55, %56 : vector<32x128xf32>
    %c0_42 = arith.constant 0 : index
    %c0_43 = arith.constant 0 : index
    %58 = vector.load %arg5[%c0_42, %c0_43] : memref<32x1xf32, #tpu.memory_space<vmem>>, vector<32x1xf32>
    %59 = vector.broadcast %58 : vector<32x1xf32> to vector<32x128xf32>
    %60 = arith.mulf %57, %59 : vector<32x128xf32>
    %cst_44 = arith.constant dense<0.000000e+00> : vector<128xf32>
    %61 = vector.multi_reduction <add>, %60, %cst_44 [0] : vector<32x128xf32> to vector<128xf32>
    %62 = vector.shape_cast %61 : vector<128xf32> to vector<1x128xf32>
    %63 = arith.addf %48, %62 : vector<1x128xf32>
    %c0_45 = arith.constant 0 : index
    %c0_46 = arith.constant 0 : index
    %64 = vector.load %arg8[%c0_45, %c0_46] : memref<1x128xf32, #tpu.memory_space<vmem>>, vector<1x128xf32>
    %65 = arith.addf %64, %63 : vector<1x128xf32>
    %c0_47 = arith.constant 0 : index
    %c0_48 = arith.constant 0 : index
    %66 = vector.load %arg8[%c0_47, %c0_48] : memref<1x128xf32, #tpu.memory_space<vmem>>, vector<1x128xf32>
    tpu.vector_store %arg8[%c0_47, %c0_48], %65 {strides = array<i32>} : memref<1x128xf32, #tpu.memory_space<vmem>>, vector<1x128xf32>,
    %c1_i32 = arith.constant 1 : i32
    %67 = arith.cmpi eq, %arg1, %c1_i32 : i32
    %68 = arith.extui %67 : i1 to i32
    %c0_i32_49 = arith.constant 0 : i32
    %69 = arith.cmpi ne, %68, %c0_i32_49 : i32
    scf.if %69 {
      %c0_50 = arith.constant 0 : index
      %c0_51 = arith.constant 0 : index
      %70 = vector.load %arg8[%c0_50, %c0_51] : memref<1x128xf32, #tpu.memory_space<vmem>>, vector<1x128xf32>
      %c0_52 = arith.constant 0 : index
      %71 = memref.load %arg6[%c0_52] : memref<1xf32, #tpu.memory_space<smem>>
      %72 = vector.broadcast %71 : f32 to vector<1x128xf32>
      %73 = arith.addf %70, %72 : vector<1x128xf32>
      %74 = arith.negf %73 : vector<1x128xf32>
      %75 = math.exp %74 : vector<1x128xf32>
      %cst_53 = arith.constant 1.000000e+00 : f32
      %76 = vector.broadcast %cst_53 : f32 to vector<1x128xf32>
      %77 = arith.addf %76, %75 : vector<1x128xf32>
      %78 = arith.divf %76, %77 : vector<1x128xf32>
      %c0_54 = arith.constant 0 : index
      %c0_55 = arith.constant 0 : index
      %79 = vector.load %arg7[%c0_54, %c0_55] : memref<1x128xf32, #tpu.memory_space<vmem>>, vector<1x128xf32>
      tpu.vector_store %arg7[%c0_54, %c0_55], %78 {strides = array<i32>} : memref<1x128xf32, #tpu.memory_space<vmem>>, vector<1x128xf32>,
    } else {
    }
    return
  }
  func.func @transform_0(%arg0: i32, %arg1: i32) -> (i32, i32, i32) {
    %c0_i32 = arith.constant 0 : i32
    %c0_i32_0 = arith.constant 0 : i32
    return %arg1, %c0_i32, %arg0 : i32, i32, i32
  }
  func.func @transform_1(%arg0: i32, %arg1: i32) -> (i32, i32) {
    %c0_i32 = arith.constant 0 : i32
    %c0_i32_0 = arith.constant 0 : i32
    %c0_i32_1 = arith.constant 0 : i32
    return %c0_i32, %c0_i32_0 : i32, i32
  }
  func.func @transform_2(%arg0: i32, %arg1: i32) -> (i32, i32) {
    %c0_i32 = arith.constant 0 : i32
    %c0_i32_0 = arith.constant 0 : i32
    %c0_i32_1 = arith.constant 0 : i32
    return %c0_i32, %c0_i32_0 : i32, i32
  }
  func.func @transform_3(%arg0: i32, %arg1: i32) -> (i32, i32) {
    %c0_i32 = arith.constant 0 : i32
    %c0_i32_0 = arith.constant 0 : i32
    %c0_i32_1 = arith.constant 0 : i32
    return %c0_i32, %c0_i32_0 : i32, i32
  }
  func.func @transform_4(%arg0: i32, %arg1: i32) -> i32 {
    %c0_i32 = arith.constant 0 : i32
    %c0_i32_0 = arith.constant 0 : i32
    return %c0_i32 : i32
  }
  func.func @transform_5(%arg0: i32, %arg1: i32) -> (i32, i32) {
    %c0_i32 = arith.constant 0 : i32
    %c0_i32_0 = arith.constant 0 : i32
    return %c0_i32, %arg0 : i32, i32
  }
}

</mosaic_0001>

<bundles_post_ra>
// kernel: tpu_custom_call.1
= control target key start
LH: loop header
LB: loop body
LE: loop exit
PB: predicated region body
PF: predicated region fallthrough
CT: control target
= control target key end

     0   :  { %s979_s0 = inlined_call_operand.vmem [shape: bf16[8,4,128], index: 0, kind: input, shape index: {}]   ;;  %s980_s1 = inlined_call_operand.vmem [shape: bf16[32,4], index: 1, kind: input, shape index: {}]   ;;  %s981_s2 = inlined_call_operand.vmem [shape: f32[32,1], index: 2, kind: input, shape index: {}]   ;;  %s982_s3 = inlined_call_operand.vmem [shape: f32[32,1], index: 3, kind: input, shape index: {}]   ;;  %s983_s4 = inlined_call_operand.<no memory space> [shape: f32[1], index: 4, kind: input, shape index: {}]   ;;  %s984_s5 = inlined_call_operand.hbm [shape: f32[1,128], index: 5, kind: output, shape index: {}]  }
   0x1   :  { %10 = sst [smem:[#allocation3]] %s983_s4 }
   0x2   :  { %11 = vsyncpa [#allocation5], 0  ;;  %s880_s20 = smov 0   ;;  %s882_s21 = smov 0  }
   0x3   :  { %s884_s22 = smov 0  }
   0x4 LB: > { %s685_s4 = sadd.s32 4294967295, %s842_s22   ;;  %s26_s23 = sadd.s32 1, %s838_s21  ;;  %s842_s22 = sphi %s884_s22, %s17_s22   ;;  %s838_s21 = sphi %s882_s21, %s987_s21   ;;  %s834_s20 = sphi %s880_s20, %s986_s20  }
   0x5   : > { %p27_p0 = scmp.ge.s32.totalorder %s26_s23, 2  ;;  %p688_p1 = scmp.ge.s32.totalorder %s842_s22, 1 }
   0x6   : > { %p207_p2 = scmp.lt.s32.totalorder %s842_s22, 3 }
   0x7   : > { %s989_s23 = smov (%p27_p0, %s26_s23), 0 }
   0x8   : > { %p208_p3 = pnand %p688_p1, %p207_p2 }
   0x9   : > { %s689_s24 = sshll.u32 (!%p208_p3), %s834_s20, 2  ;;  %p691_p5 = scmp.ne.s32.totalorder (!%p208_p3), %s834_s20, 0 }
   0xa   : > { %211 = sbr.rel (%p208_p3) target bundleno = 322 (0x142), region = 40  ;;  %p234_p4 = scmp.lt.s32.totalorder (!%p208_p3), %s689_s24, 7 }
   0xf   : > { %s991_s24 = smov (!%p234_p4, %s689_s24), 7  ;;  %246 = sbr.rel (%p691_p5) target bundleno = 22 (0x16), region = 44 }
  0x10   : > { %s690_s25 = sshll.u32 %s991_s24, 1 }
  0x11   : > { %s240_s28 = scalar_lea.vmem %s979_s0, %s690_s25 }
  0x14   : > { %v844_v0 = vmov 0.0  }
  0x15   : > { %247 = vst [vmem:[#allocation2] sm:$0x1] %v844_v0 }
  0x16 PF: > { %v252_v1 = vld [vmem:[%s240_s28] sm:$0x3]  ;;  %vm294_vm0 = vcmask 1041408   ;;  %v696_v2 = vld [vmem:[%s240_s28 + $0x2] sm:$0x3]  ;;  %vm287_vm1 = vcmask 31744  }
  0x17   : > { %v786_v3 = vld [vmem:[%s980_s1] sm:$0xff]   ;;  %747 = vmatprep.subr.msk.bf16.mxu0 %vm294_vm0, %v252_v1  ;;  %748 = vmatprep.subr.msk.bf16.mxu1 %vm294_vm0, %v696_v2  ;;  %v296_v4 = vsel %vm294_vm0, %v252_v1, 0  ;;  %v392_v5 = vsel %vm294_vm0, %v696_v2, 0  ;;  %v787_v6 = vld [vmem:[%s980_s1 + $0x8] sm:$0xff]   ;;  %v255_v12 = vld [vmem:[%s981_s2 + $0x10] sm:$0xff]  ;;  %v845_v13 = vmov 0  }
  0x18   : > { %724 = vmatpush3.bf16.msra.mxu0 %v296_v4  ;;  %730 = vmatpush3.bf16.msra.mxu1 %v392_v5  ;;  %v699_v7 = vld [vmem:[%s240_s28 + $0x4] sm:$0x3]  ;;  %v702_v8 = vld [vmem:[%s240_s28 + $0x6] sm:$0x3]  ;;  %v254_v14 = vld [vmem:[%s981_s2 + $0x8] sm:$0xff]  ;;  %p705_p6 = scmp.ne.s32.totalorder %s834_s20, 1 }
  0x19   : > { %725 = vmatprep.mubr.msk.bf16.mxu0 %vm287_vm1, %v786_v3  ;;  %731 = vmatprep.mubr.msk.bf16.mxu1 %vm287_vm1, %v786_v3  ;;  %v464_v9 = vsel %vm294_vm0, %v699_v7, 0  ;;  %v536_v10 = vsel %vm294_vm0, %v702_v8, 0  ;;  %v253_v11 = vld [vmem:[%s981_s2] sm:$0xff]  ;;  %v256_v15 = vld [vmem:[%s981_s2 + $0x18] sm:$0xff]  ;;  %v352_v17 = vld [vmem:[%s982_s3 + $0x8] sm:$0xff]  ;;  %s613_s28 = sld [smem:[#allocation3]] (!%p705_p6) }
  0x1a   : > { %749 = vmatprep.subr.msk.bf16.mxu0 %vm294_vm0, %v699_v7  ;;  %750 = vmatprep.subr.msk.bf16.mxu1 %vm294_vm0, %v702_v8  ;;  %v351_v16 = vld [vmem:[%s982_s3] sm:$0xff]  ;;  %v353_v18 = vld [vmem:[%s982_s3 + $0x10] sm:$0xff]  ;;  %v354_v19 = vld [vmem:[%s982_s3 + $0x18] sm:$0xff] }
  0x1b   : > { %726 = vmatmul.mubr.msk.bf16.vlgmr.msra.gmra.mxu0 %vm287_vm1, %v787_v6  ;;  %732 = vmatmul.mubr.msk.bf16.vlgmr.msra.gmra.mxu1 %vm287_vm1, %v787_v6 }
  0x1c   : > { %736 = vmatpush3.bf16.msra.mxu0 %v464_v9  ;;  %742 = vmatpush3.bf16.msra.mxu1 %v536_v10 }
  0x1d   : > { %737 = vmatprep.mubr.msk.bf16.mxu0 %vm287_vm1, %v786_v3  ;;  %743 = vmatprep.mubr.msk.bf16.mxu1 %vm287_vm1, %v786_v3 }
  0x1e   : > { %784 = vset.pattern.permute.xlu0 %v845_v13  ;;  %785 = vset.pattern.permute.xlu1 %v845_v13 }
  0x1f   : > { %259 = vperm.xlu0 %784, %v253_v11   ;;  %269 = vperm.xlu1 %785, %v255_v12  }
  0x23   : > { %738 = vmatmul.mubr.msk.bf16.vlgmr.msra.gmra.mxu0 %vm287_vm1, %v787_v6  ;;  %744 = vmatmul.mubr.msk.bf16.vlgmr.msra.gmra.mxu1 %vm287_vm1, %v787_v6 }
  0x24   : > { %264 = vperm.xlu0 %784, %v254_v14   ;;  %274 = vperm.xlu1 %785, %v256_v15  }
  0x28   : > { %357 = vperm.xlu0 %784, %v351_v16   ;;  %362 = vperm.xlu1 %785, %v352_v17  }
  0x2c   : > { %367 = vperm.xlu0 %784, %v353_v18   ;;  %372 = vperm.xlu1 %785, %v354_v19  }
  0x9a   : > { %v260_v20 = vpop.permute.xlu0 %259  ;;  %v270_v21 = vpop.permute.xlu1 %269 }
  0x9f   : > { %v265_v22 = vpop.permute.xlu0 %264  ;;  %v275_v25 = vpop.permute.xlu1 %274 }
  0xa3   : > { %v358_v28 = vpop.permute.xlu0 %357  ;;  %v363_v39 = vpop.permute.xlu1 %362 }
  0xa7   : > { %v368_v48 = vpop.permute.xlu0 %367  ;;  %v373_v1 = vpop.permute.xlu1 %372 }
  0xdb   : > { %v727_v23 = vpop.f32.mrf.mxu0  ;;  %v733_v24 = vpop.f32.mrf.mxu1 }
  0xdc   : > { %v341_v33 = vadd.f32 %v727_v23, %v270_v21  ;;  %v437_v34 = vadd.f32 %v733_v24, %v270_v21 }
  0xdd   : > { %v332_v26 = vpop.f32.mrf.mxu0  ;;  %v428_v27 = vpop.f32.mrf.mxu1 }
  0xde   : > { %v333_v29 = vadd.f32 %v332_v26, %v260_v20  ;;  %v429_v30 = vadd.f32 %v428_v27, %v260_v20  ;;  %v349_v46 = vmax.f32 %v341_v33, 0.0  ;;  %v445_v47 = vmax.f32 %v437_v34, 0.0 }
  0xdf   : > { %v728_v31 = vpop.f32.mrf.mxu0  ;;  %v734_v32 = vpop.f32.mrf.mxu1 }
  0xe0   : > { %v347_v37 = vmax.f32 %v333_v29, 0.0  ;;  %v443_v38 = vmax.f32 %v429_v30, 0.0  ;;  %v344_v40 = vadd.f32 %v728_v31, %v275_v25  ;;  %v440_v41 = vadd.f32 %v734_v32, %v275_v25 }
  0xe1   : > { %v335_v35 = vpop.f32.mrf.mxu0  ;;  %v431_v36 = vpop.f32.mrf.mxu1  ;;  %v377_v63 = vmul.f32 %v368_v48, %v349_v46  ;;  %v449_v0 = vmul.f32 %v445_v47, %v368_v48 }
  0xe2   : > { %v336_v42 = vadd.f32 %v335_v35, %v265_v22  ;;  %v432_v43 = vadd.f32 %v431_v36, %v265_v22  ;;  %v375_v53 = vmul.f32 %v358_v28, %v347_v37  ;;  %v447_v54 = vmul.f32 %v443_v38, %v358_v28 }
  0xe3   : > { %v739_v44 = vpop.f32.mrf.mxu0  ;;  %v745_v45 = vpop.f32.mrf.mxu1  ;;  %v350_v57 = vmax.f32 %v344_v40, 0.0  ;;  %v446_v58 = vmax.f32 %v440_v41, 0.0 }
  0xe4   : > { %v348_v49 = vmax.f32 %v336_v42, 0.0  ;;  %v444_v50 = vmax.f32 %v432_v43, 0.0  ;;  %v509_v2 = vadd.f32 %v739_v44, %v270_v21  ;;  %v581_v3 = vadd.f32 %v745_v45, %v270_v21 }
  0xe5   : > { %v500_v51 = vpop.f32.mrf.mxu0  ;;  %v572_v52 = vpop.f32.mrf.mxu1  ;;  %v378_v16 = vmul.f32 %v373_v1, %v350_v57  ;;  %v450_v17 = vmul.f32 %v446_v58, %v373_v1 }
  0xe6   : > { %v501_v55 = vadd.f32 %v500_v51, %v260_v20  ;;  %v573_v56 = vadd.f32 %v572_v52, %v260_v20  ;;  %v376_v59 = vmul.f32 %v363_v39, %v348_v49  ;;  %v448_v60 = vmul.f32 %v444_v50, %v363_v39 }
  0xe7   : > { %v740_v61 = vpop.f32.mrf.mxu0  ;;  %v746_v62 = vpop.f32.mrf.mxu1  ;;  %v517_v18 = vmax.f32 %v509_v2, 0.0  ;;  %v589_v19 = vmax.f32 %v581_v3, 0.0  ;;  %v605_v2 = vld [vmem:[#allocation2] sm:$0x1] }
  0xe8   : > { %v379_v4 = vadd.f32 %v376_v59, %v375_v53  ;;  %v451_v5 = vadd.f32 %v448_v60, %v447_v54  ;;  %v515_v6 = vmax.f32 %v501_v55, 0.0  ;;  %v587_v7 = vmax.f32 %v573_v56, 0.0 }
  0xe9   : > { %v503_v8 = vpop.f32.mrf.mxu0  ;;  %v575_v9 = vpop.f32.mrf.mxu1  ;;  %v512_v10 = vadd.f32 %v740_v61, %v275_v25  ;;  %v584_v11 = vadd.f32 %v746_v62, %v275_v25  ;;  %v521_v34 = vmul.f32 %v517_v18, %v368_v48 }
  0xea   : > { %v504_v12 = vadd.f32 %v503_v8, %v265_v22  ;;  %v576_v13 = vadd.f32 %v575_v9, %v265_v22  ;;  %v380_v14 = vadd.f32 %v379_v4, %v377_v63  ;;  %v452_v15 = vadd.f32 %v451_v5, %v449_v0 }
  0xeb   : > { %v519_v26 = vmul.f32 %v515_v6, %v358_v28  ;;  %v591_v27 = vmul.f32 %v587_v7, %v358_v28  ;;  %v518_v29 = vmax.f32 %v512_v10, 0.0  ;;  %v590_v30 = vmax.f32 %v584_v11, 0.0 }
  0xec   : > { %v516_v20 = vmax.f32 %v504_v12, 0.0  ;;  %v588_v23 = vmax.f32 %v576_v13, 0.0  ;;  %v381_v24 = vadd.f32 %v380_v14, %v378_v16  ;;  %v453_v21 = vadd.f32 %v452_v15, %v450_v17 }
  0xed   : > { %v593_v22 = vmul.f32 %v589_v19, %v368_v48  ;;  %v522_v40 = vmul.f32 %v518_v29, %v373_v1  ;;  %v594_v41 = vmul.f32 %v590_v30, %v373_v1 }
  0xee   : > { %v520_v31 = vmul.f32 %v516_v20, %v363_v39  ;;  %v592_v32 = vmul.f32 %v588_v23, %v363_v39  ;;  %v382_v33 = vrot.slane %v381_v24, 4  ;;  %v454_v25 = vrot.slane %v453_v21, 4 }
  0xf0   : > { %v523_v35 = vadd.f32 %v520_v31, %v519_v26  ;;  %v595_v36 = vadd.f32 %v592_v32, %v591_v27  ;;  %v383_v37 = vadd.f32 %v382_v33, %v381_v24  ;;  %v455_v38 = vadd.f32 %v454_v25, %v453_v21 }
  0xf2   : > { %v524_v42 = vadd.f32 %v523_v35, %v521_v34  ;;  %v596_v43 = vadd.f32 %v595_v36, %v593_v22  ;;  %v384_v44 = vrot.slane %v383_v37, 2  ;;  %v456_v45 = vrot.slane %v455_v38, 2 }
  0xf4   : > { %v525_v46 = vadd.f32 %v524_v42, %v522_v40  ;;  %v597_v28 = vadd.f32 %v596_v43, %v594_v41  ;;  %v385_v47 = vadd.f32 %v384_v44, %v383_v37  ;;  %v457_v49 = vadd.f32 %v456_v45, %v455_v38 }
  0xf6   : > { %v526_v50 = vrot.slane %v525_v46, 4  ;;  %v598_v39 = vrot.slane %v597_v28, 4  ;;  %v386_v51 = vrot.slane %v385_v47, 1  ;;  %v458_v52 = vrot.slane %v457_v49, 1 }
  0xf8   : > { %v527_v53 = vadd.f32 %v526_v50, %v525_v46  ;;  %v599_v48 = vadd.f32 %v598_v39, %v597_v28  ;;  %v387_v56 = vadd.f32 %v386_v51, %v385_v47  ;;  %v459_v57 = vadd.f32 %v458_v52, %v457_v49 }
  0xfa   : > { %v528_v54 = vrot.slane %v527_v53, 2  ;;  %v600_v55 = vrot.slane %v599_v48, 2  ;;  %v460_v62 = vadd.f32 %v459_v57, %v387_v56 }
  0xfc   : > { %v529_v58 = vadd.f32 %v528_v54, %v527_v53  ;;  %v601_v59 = vadd.f32 %v600_v55, %v599_v48 }
  0xfe   : > { %v530_v60 = vrot.slane %v529_v58, 1  ;;  %v602_v61 = vrot.slane %v601_v59, 1 }
 0x100   : > { %v531_v63 = vadd.f32 %v530_v60, %v529_v58  ;;  %v603_v1 = vadd.f32 %v602_v61, %v601_v59 }
 0x102   : > { %v532_v0 = vadd.f32 %v531_v63, %v460_v62 }
 0x104   : > { %v604_v3 = vadd.f32 %v603_v1, %v532_v0  ;;  %611 = sbr.rel (%p705_p6) target bundleno = 307 (0x133), region = 48 }
 0x106   : > { %v606_v4 = vadd.f32 %v605_v2, %v604_v3 }
 0x108   : > { %607 = vst [vmem:[#allocation2] sm:$0x1] %v606_v4 }
 0x109   : > { %v614_v6 = vstv %s613_s28 }
 0x10f   : > { %v612_v5 = vld [vmem:[#allocation2] sm:$0x1] }
 0x110   : > { %v615_v7 = vadd.f32 %v614_v6, %v612_v5 }
 0x112   : > { %v706_v8 = vmul.f32 -1.442695, %v615_v7 }
 0x114   : > { %788 = vpow2.f32 %v706_v8 }
 0x121   : > { %v789_v9 = vpop.eup %788 }
 0x122   : > { %v619_v10 = vadd.f32 1.0, %v789_v9 }
 0x124   : > { %790 = vrcp.f32 %v619_v10 }
 0x131   : > { %v791_v11 = vpop.eup %790 }
 0x132   : > { %622 = vst [vmem:[#allocation4] sm:$0x1] %v791_v11 }
 0x133 PF: > { %p955_p7 = scmp.eq.s32.totalorder %s685_s4, 1  ;;  %s846_s20 = smov [#allocation4]  }
 0x134   : > { %s632_s30 = sshll.u32 %s846_s20, 4  ;;  %s633_s30 = int_to_ptr.vmem [resolvable:$true] %s632_s30 }
 0x135   : > { %s792_s6 = scalar_lea.vmem %s633_s30, 16  ;;  %s798_s7 = scalar_lea.vmem %s633_s30, 32 }
 0x136   : > { %p793_p8 = scmp.ne.s32.totalorder %s633_s30, %s792_s6  ;;  %p799_p11 = scmp.lt.s32.totalorder %s633_s30, %s633_s30 }
 0x137   : > { %p800_p12 = scmp.lt.s32.totalorder %s798_s7, %s792_s6 }
 0x138   : > { %p794_p9 = pnand %p793_p8, %p955_p7 }
 0x139   : > { %p801_p13 = por %p800_p12, %p799_p11 }
 0x13a   : > { %p795_p10 = pneg %p794_p9 }
 0x13c   : > { %p802_p0 = pnand %p801_p13, %p795_p10 }
 0x13e   : > { %805 = shalt.err (!%p802_p0)
}
 0x13f   : > { %752 = dma.vmem_to_hbm [thread:$0]  (%p955_p7), %s633_s30, 16, %s984_s5, [#allocation5]  }
 0x140   : > { %829 = dma.done.wait (%p955_p7), [#allocation5], 16  }
 0x141   : > { %831 = vsyncadd (%p955_p7), [#allocation5], 4294967280 }
 0x142 PF: > { %s17_s22 = sadd.s32 1, %s842_s22   ;;  %s986_s20 = smov %s838_s21 }
 0x143   : > { %p14_p1 = scmp.ge.s32.totalorder %s17_s22, 4   ;;  %s987_s21 = smov %s989_s23 }
 0x145   :  { %16 = sbr.rel (!%p14_p1) target bundleno = 4 (0x4), region = 79 }
 0x14a   :  { %645 = vsyncpa [#allocation5], 1 }
 0x14b   :  { %647 = vsyncpa [#allocation5 + $0x1], 1 }

</bundles_post_ra>
